<compile_context>
chip_gen: v7x
topology: tpu7x:2x2x1
jax: 0.10.0
libtpu: 0.0.40
codegen_flags: <defaults>
</compile_context>

<pallas_src>
import jax
import jax.numpy as jnp
from jax.experimental import pallas as pl
from jax.experimental.pallas import tpu as pltpu


# ----------------------------------------------------------------------------
# helpers
# ----------------------------------------------------------------------------
def _round_up(x, m):
    return ((x + m - 1) // m) * m


def _cdiv(a, b):
    return (a + b - 1) // b


def _vmem_bytes(tm, tk, K_pad, Cout_pad, resident_w):
    patch = 2 * tm * tk * 2                      # bf16 patch tiles, 2 buffers
    if resident_w:
        weight = K_pad * Cout_pad * 2            # whole bf16 weight, resident
    else:
        weight = 2 * tk * Cout_pad * 2           # bf16 weight tiles, 2 buffers
    bn = 2 * 2 * Cout_pad * 4                    # scale / shift
    out = 2 * tm * Cout_pad * 4                  # f32 output tiles, 2 buffers
    return patch + weight + bn + out


def _hw_params():
    """(vmem_capacity_bytes, num_tensorcores) with conservative fallbacks."""
    vmem_cap = 64 * 1024 * 1024                  # safe default (v7x)
    try:
        info = pltpu.get_tpu_info()
        cap = int(getattr(info, "vmem_capacity_bytes", 0) or 0)
        if cap > 0:
            vmem_cap = cap
    except Exception:
        pass
    num_cores = 2                                # assume megacore unless known
    try:
        kind = jax.devices()[0].device_kind.lower()
        if ("lite" in kind) or ("v5e" in kind) or ("v6e" in kind):
            num_cores = 1                        # single-TensorCore chips
    except Exception:
        pass
    return vmem_cap, num_cores


def _plan(M, K, Cout):
    """Pick (tm, tk, K_pad, Cout_pad, resident_w, vmem_limit)."""
    vmem_cap, num_cores = _hw_params()
    Cout_pad = _round_up(Cout, 128)

    # Reduction tile: exact fit when K (padded to 128) is small; otherwise the
    # candidate minimizing K zero-padding waste (ties -> larger tk).
    K128 = _round_up(K, 128)
    if K128 <= 512:
        tk = K128
    else:
        tk = min((512, 384, 256, 128),
                 key=lambda t: (_round_up(K, t) - K, -t))
    K_pad = _round_up(K, tk)

    # Keep the whole weight resident in VMEM when small: DMA'd once instead of
    # once per M tile.
    resident_w = K_pad * Cout_pad * 2 <= 8 * 1024 * 1024

    budget = int(0.55 * vmem_cap)
    m_cap = max(128, _round_up(M, 128))
    candidates = [tm for tm in (1024, 512, 256, 128) if tm <= m_cap]
    if not candidates:
        candidates = [128]
    feasible = [tm for tm in candidates
                if _vmem_bytes(tm, tk, K_pad, Cout_pad, resident_w) <= budget]
    if not feasible:
        resident_w = False
        feasible = [tm for tm in candidates
                    if _vmem_bytes(tm, tk, K_pad, Cout_pad, False) <= budget]
    if not feasible:
        # TODO(synk): add a Cout (tn) grid axis for very wide layers instead.
        feasible = [128]

    if num_cores >= 2:
        balanced = [tm for tm in feasible
                    if _cdiv(M, tm) >= 2 and _cdiv(M, tm) % 2 == 0]
        tm = balanced[0] if balanced else feasible[0]
    else:
        tm = feasible[0]                          # single-TC: just go big

    req = _vmem_bytes(tm, tk, K_pad, Cout_pad, resident_w)
    vmem_limit = int(min(max(2 * req, 32 * 1024 * 1024),
                         0.85 * vmem_cap, 96 * 1024 * 1024))
    vmem_limit = max(vmem_limit, req + (4 << 20))  # never below the real need
    return tm, tk, K_pad, Cout_pad, resident_w, vmem_limit


# ----------------------------------------------------------------------------
# Pallas kernel: K-tiled GEMM accumulating into the resident output block,
# with BatchNorm(scale, shift) + ReLU applied in place on the last k step.
# ----------------------------------------------------------------------------
def _make_kernel(*, tk, n_k, resident_w):
    def kernel(p_ref, w_ref, scale_ref, shift_ref, o_ref):
        # p_ref:     (tm, tk)            bf16 im2col patch tile
        # w_ref:     (tk|K_pad, Cout_pad) bf16 weights (tile or resident block)
        # scale_ref: (1, Cout_pad)        f32 gamma / sqrt(var + eps)
        # shift_ref: (1, Cout_pad)        f32 beta - mean * scale
        # o_ref:     (tm, Cout_pad)       f32, resident across the k axis
        k = pl.program_id(1)

        if resident_w and n_k > 1:
            start = pl.multiple_of(k * tk, 128)
            w = w_ref[pl.ds(start, tk), :]
        else:
            w = w_ref[...]

        contrib = jnp.dot(p_ref[...], w, preferred_element_type=jnp.float32)

        if n_k == 1:
            o_ref[...] = jnp.maximum(
                contrib * scale_ref[...] + shift_ref[...], 0.0)
        else:
            @pl.when(k == 0)
            def _():
                o_ref[...] = contrib          # no zero-fill + re-read

            @pl.when(k != 0)
            def _():
                o_ref[...] = o_ref[...] + contrib

            @pl.when(k == n_k - 1)
            def _():
                o_ref[...] = jnp.maximum(
                    o_ref[...] * scale_ref[...] + shift_ref[...], 0.0)

    return kernel


def _gemm_bn_relu(patches, w2d, scale, shift, *, tm, tk, resident_w,
                  vmem_limit):
    M_pad, K_pad = patches.shape
    _, Cout_pad = w2d.shape
    assert M_pad % tm == 0 and K_pad % tk == 0 and Cout_pad % 128 == 0
    n_k = K_pad // tk

    if resident_w:
        w_spec = pl.BlockSpec((K_pad, Cout_pad), lambda i, k: (0, 0))
    else:
        w_spec = pl.BlockSpec((tk, Cout_pad), lambda i, k: (k, 0))

    return pl.pallas_call(
        _make_kernel(tk=tk, n_k=n_k, resident_w=resident_w),
        out_shape=jax.ShapeDtypeStruct((M_pad, Cout_pad), jnp.float32),
        grid_spec=pltpu.PrefetchScalarGridSpec(
            num_scalar_prefetch=0,
            grid=(M_pad // tm, n_k),
            in_specs=[
                pl.BlockSpec((tm, tk), lambda i, k: (i, k)),
                w_spec,
                pl.BlockSpec((1, Cout_pad), lambda i, k: (0, 0)),
                pl.BlockSpec((1, Cout_pad), lambda i, k: (0, 0)),
            ],
            out_specs=pl.BlockSpec((tm, Cout_pad), lambda i, k: (i, 0)),
        ),
        compiler_params=pltpu.CompilerParams(
            dimension_semantics=("parallel", "arbitrary"),
            vmem_limit_bytes=vmem_limit),
    )(patches, w2d, scale, shift)


# ----------------------------------------------------------------------------
# BasicConv2d forward: conv(no bias) -> BN(eval, eps=1e-3) -> ReLU
# ----------------------------------------------------------------------------
def basic_conv2d(x_nchw, weight_oihw, gamma, beta, run_mean, run_var,
                 *, stride=1, padding=1, eps=1e-3):
    N, Cin, H, W = x_nchw.shape
    Cout, _, KH, KW = weight_oihw.shape
    Ho = (H + 2 * padding - KH) // stride + 1
    Wo = (W + 2 * padding - KW) // stride + 1
    M = N * Ho * Wo
    K = Cin * KH * KW

    # bf16 patch extraction straight to a feature-last layout.  Output is
    # (N, Ho, Wo, Cin*KH*KW) with the feature dim ordered channel-major:
    # (cin, kh, kw).  No f32 patch tensor, no post-hoc transpose, no cast.
    patches = jax.lax.conv_general_dilated_patches(
        x_nchw.astype(jnp.bfloat16), filter_shape=(KH, KW),
        window_strides=(stride, stride),
        padding=[(padding, padding), (padding, padding)],
        dimension_numbers=("NCHW", "HWIO", "NHWC"))
    patches = patches.reshape(M, K)

    # (Cout, Cin, KH, KW) -> (Cin, KH, KW, Cout) -> (K, Cout): matches the
    # (cin, kh, kw) patch feature ordering.  Weights are tiny.
    w2d = jnp.transpose(weight_oihw, (1, 2, 3, 0)).reshape(K, Cout)
    w2d = w2d.astype(jnp.bfloat16)

    # Inference BatchNorm folded to per-channel scale/shift (f32 epilogue).
    inv_std = gamma.astype(jnp.float32) / jnp.sqrt(
        run_var.astype(jnp.float32) + eps)
    scale = inv_std
    shift = beta.astype(jnp.float32) - run_mean.astype(jnp.float32) * inv_std

    tm, tk, K_pad, Cout_pad, resident_w, vmem_limit = _plan(M, K, Cout)
    M_pad = _round_up(M, tm)

    patches_p = jnp.pad(patches, ((0, M_pad - M), (0, K_pad - K)))
    w2d_p = jnp.pad(w2d, ((0, K_pad - K), (0, Cout_pad - Cout)))
    scale_p = jnp.pad(scale.reshape(1, Cout), ((0, 0), (0, Cout_pad - Cout)))
    shift_p = jnp.pad(shift.reshape(1, Cout), ((0, 0), (0, Cout_pad - Cout)))

    out = _gemm_bn_relu(patches_p, w2d_p, scale_p, shift_p,
                        tm=tm, tk=tk, resident_w=resident_w,
                        vmem_limit=vmem_limit)

    # TODO(synk): an NHWC-consuming downstream would avoid this final layout
    # pass; kept NCHW to match the PyTorch module's output layout.
    out = out[:M, :Cout].reshape(N, Ho, Wo, Cout)
    return jnp.transpose(out, (0, 3, 1, 2))


# ----------------------------------------------------------------------------
# Reference (pure JAX) for sanity checking
# ----------------------------------------------------------------------------
def basic_conv2d_ref(x_nchw, weight_oihw, gamma, beta, run_mean, run_var,
                     *, stride=1, padding=1, eps=1e-3):
    y = jax.lax.conv_general_dilated(
        x_nchw.astype(jnp.float32), weight_oihw.astype(jnp.float32),
        window_strides=(stride, stride),
        padding=[(padding, padding), (padding, padding)],
        dimension_numbers=("NCHW", "OIHW", "NCHW"),
        precision=jax.lax.Precision.HIGHEST)
    inv_std = gamma / jnp.sqrt(run_var + eps)
    scale = inv_std.reshape(1, -1, 1, 1)
    shift = (beta - run_mean * inv_std).reshape(1, -1, 1, 1)
    return jnp.maximum(y * scale + shift, 0.0)


if __name__ == "__main__":
    key = jax.random.PRNGKey(0)
    k_x, k_w, k_g, k_b, k_m, k_v = jax.random.split(key, 6)

    # Small shapes consistent with the module: in=4, out=8, kernel 3x3, pad=1.
    N, Cin, H, W = 2, 4, 16, 16
    Cout, KH, KW = 8, 3, 3

    x = jax.random.normal(k_x, (N, Cin, H, W), dtype=jnp.float32)
    weight = jax.random.normal(k_w, (Cout, Cin, KH, KW), dtype=jnp.float32) * 0.1
    gamma = jax.random.uniform(k_g, (Cout,), minval=0.5, maxval=1.5)
    beta = jax.random.normal(k_b, (Cout,)) * 0.1
    run_mean = jax.random.normal(k_m, (Cout,)) * 0.1
    run_var = jax.random.uniform(k_v, (Cout,), minval=0.5, maxval=1.5)

    out = basic_conv2d(x, weight, gamma, beta, run_mean, run_var,
                       stride=1, padding=1, eps=1e-3)
    out = jax.block_until_ready(out)
    assert out.shape == (N, Cout, H, W), out.shape

    # Reference fed with bf16-rounded conv operands (the kernel's MXU dtype);
    # the BN/ReLU epilogue is f32 in both paths, so this isolates only the
    # f32-accumulation order difference.
    x_r = x.astype(jnp.bfloat16).astype(jnp.float32)
    w_r = weight.astype(jnp.bfloat16).astype(jnp.float32)
    ref = basic_conv2d_ref(x_r, w_r, gamma, beta, run_mean, run_var,
                           stride=1, padding=1, eps=1e-3)

    max_err = float(jnp.max(jnp.abs(out - ref)))
    assert jnp.allclose(out, ref, atol=2e-3, rtol=2e-3), max_err
    print("KERNEL_OK")
</pallas_src>

<mosaic_0001>
module attributes {stable_mosaic.version = 11 : i64} {
  func.func @kernel(%arg0: i32, %arg1: i32, %arg2: memref<256x128xbf16, #tpu.memory_space<vmem>>, %arg3: memref<128x128xbf16, #tpu.memory_space<vmem>>, %arg4: memref<1x128xf32, #tpu.memory_space<vmem>>, %arg5: memref<1x128xf32, #tpu.memory_space<vmem>>, %arg6: memref<256x128xf32, #tpu.memory_space<vmem>>) attributes {dimension_semantics = [#tpu.dimension_semantics<parallel>, #tpu.dimension_semantics<arbitrary>], iteration_bounds = array<i64: 2, 1>, scalar_prefetch = 0 : i64, scratch_operands = 0 : i64, tpu.core_type = #tpu.core_type<tc>, window_params = [{transform_indices = @transform_0, window_bounds = array<i64: 256, 128>}, {pipeline_mode = #tpu.pipeline_mode<synchronous>, transform_indices = @transform_1, window_bounds = array<i64: 128, 128>}, {pipeline_mode = #tpu.pipeline_mode<synchronous>, transform_indices = @transform_2, window_bounds = array<i64: 1, 128>}, {pipeline_mode = #tpu.pipeline_mode<synchronous>, transform_indices = @transform_3, window_bounds = array<i64: 1, 128>}, {transform_indices = @transform_4, window_bounds = array<i64: 256, 128>}]} {
    %c0 = arith.constant 0 : index
    %c0_0 = arith.constant 0 : index
    %0 = vector.load %arg3[%c0, %c0_0] : memref<128x128xbf16, #tpu.memory_space<vmem>>, vector<128x128xbf16>
    %c0_1 = arith.constant 0 : index
    %c0_2 = arith.constant 0 : index
    %1 = vector.load %arg2[%c0_1, %c0_2] : memref<256x128xbf16, #tpu.memory_space<vmem>>, vector<256x128xbf16>
    %cst = arith.constant dense<0.000000e+00> : vector<256x128xf32>
    %2 = tpu.matmul %1, %0, %cst {dimension_numbers = #tpu.dot_dimension_numbers<[1], [0], [0], [1], [0, 0, 1, 1], [], []>} : vector<256x128xbf16>, vector<128x128xbf16>, vector<256x128xf32> -> vector<256x128xf32>
    %c0_3 = arith.constant 0 : index
    %c0_4 = arith.constant 0 : index
    %3 = vector.load %arg4[%c0_3, %c0_4] : memref<1x128xf32, #tpu.memory_space<vmem>>, vector<1x128xf32>
    %4 = vector.broadcast %3 : vector<1x128xf32> to vector<256x128xf32>
    %5 = arith.mulf %2, %4 : vector<256x128xf32>
    %c0_5 = arith.constant 0 : index
    %c0_6 = arith.constant 0 : index
    %6 = vector.load %arg5[%c0_5, %c0_6] : memref<1x128xf32, #tpu.memory_space<vmem>>, vector<1x128xf32>
    %7 = vector.broadcast %6 : vector<1x128xf32> to vector<256x128xf32>
    %8 = arith.addf %5, %7 : vector<256x128xf32>
    %cst_7 = arith.constant 0.000000e+00 : f32
    %9 = vector.broadcast %cst_7 : f32 to vector<256x128xf32>
    %10 = arith.maximumf %8, %9 : vector<256x128xf32>
    %c0_8 = arith.constant 0 : index
    %c0_9 = arith.constant 0 : index
    %11 = vector.load %arg6[%c0_8, %c0_9] : memref<256x128xf32, #tpu.memory_space<vmem>>, vector<256x128xf32>
    tpu.vector_store %arg6[%c0_8, %c0_9], %10 {strides = array<i32>} : memref<256x128xf32, #tpu.memory_space<vmem>>, vector<256x128xf32>,
    return
  }
  func.func @transform_0(%arg0: i32, %arg1: i32) -> (i32, i32) {
    %c0_i32 = arith.constant 0 : i32
    return %arg0, %arg1 : i32, i32
  }
  func.func @transform_1(%arg0: i32, %arg1: i32) -> (i32, i32) {
    %c0_i32 = arith.constant 0 : i32
    %c0_i32_0 = arith.constant 0 : i32
    %c0_i32_1 = arith.constant 0 : i32
    return %c0_i32, %c0_i32_0 : i32, i32
  }
  func.func @transform_2(%arg0: i32, %arg1: i32) -> (i32, i32) {
    %c0_i32 = arith.constant 0 : i32
    %c0_i32_0 = arith.constant 0 : i32
    %c0_i32_1 = arith.constant 0 : i32
    return %c0_i32, %c0_i32_0 : i32, i32
  }
  func.func @transform_3(%arg0: i32, %arg1: i32) -> (i32, i32) {
    %c0_i32 = arith.constant 0 : i32
    %c0_i32_0 = arith.constant 0 : i32
    %c0_i32_1 = arith.constant 0 : i32
    return %c0_i32, %c0_i32_0 : i32, i32
  }
  func.func @transform_4(%arg0: i32, %arg1: i32) -> (i32, i32) {
    %c0_i32 = arith.constant 0 : i32
    %c0_i32_0 = arith.constant 0 : i32
    return %arg0, %c0_i32 : i32, i32
  }
}

</mosaic_0001>

<bundles_post_ra>
// kernel: tpu_custom_call.1
= control target key start
LH: loop header
LB: loop body
LE: loop exit
PB: predicated region body
PF: predicated region fallthrough
CT: control target
= control target key end

     0   :  { %9 = vsyncpa [#allocation3], 0  ;;  %s1613_s0 = inlined_call_operand.hbm [shape: bf16[512,128], index: 0, kind: input, shape index: {}]   ;;  %s1614_s1 = inlined_call_operand.hbm [shape: bf16[128,128], index: 1, kind: input, shape index: {}]   ;;  %s1615_s2 = inlined_call_operand.vmem [shape: f32[1,128], index: 2, kind: input, shape index: {}]   ;;  %s1616_s3 = inlined_call_operand.vmem [shape: f32[1,128], index: 3, kind: input, shape index: {}]   ;;  %s1617_s4 = inlined_call_operand.hbm [shape: f32[512,128], index: 4, kind: output, shape index: {}]  }
   0x1   :  { %11 = vsyncpa [#allocation3 + $0x1], 0 }
   0x2   :  { %12 = vsyncpa [#allocation6], 0 }
   0x3   :  { %13 = vsyncpa [#allocation4], 0 }
   0x4   :  { %15 = vsyncpa [#allocation4 + $0x1], 0  ;;  %s1260_s15 = smov 0   ;;  %s1262_s16 = smov 0  }
   0x5   :  { %s1264_s17 = smov 0   ;;  %s1266_s18 = smov 0  }
   0x6   :  { %s1268_s19 = smov 0   ;;  %s1270_s20 = smov 0  }
   0x7 LB: > { %s848_s21 = sadd.s32 4294967295, %s1226_s20   ;;  %s849_s22 = sadd.s32 4294967294, %s1226_s20   ;;  %s1226_s20 = sphi %s1270_s20, %s21_s20   ;;  %s1222_s19 = sphi %s1268_s19, %s1641_s19   ;;  %s1218_s18 = sphi %s1266_s18, %s1640_s18   ;;  %s1214_s17 = sphi %s1264_s17, %s1639_s17   ;;  %s1210_s16 = sphi %s1262_s16, %s1638_s16   ;;  %s1206_s15 = sphi %s1260_s15, %s1637_s15  }
   0x8   : > { %p55_p0 = scmp.ne.s32.totalorder %s1210_s16, %s1206_s15  ;;  %p1294_p1 = scmp.eq.s32.totalorder %s848_s21, 0 }
   0x9   : > { %p1298_p2 = scmp.eq.s32.totalorder %s848_s21, 1  ;;  %p148_p3 = scmp.eq.s32.totalorder %s849_s22, 1 }
   0xa   : > { %s1622_s23 = scalar_select %p1294_p1, 1, 0 }
   0xb   : > { %s1623_s24 = scalar_select %p1298_p2, 1, 0 }
   0xc   : > { %p1304_p4 = por %p1294_p1, %p55_p0  ;;  %p850_p5 = scmp.ge.s32.totalorder %s1226_s20, 1 }
   0xd   : > { %p1309_p6 = por %p148_p3, %p55_p0  ;;  %p155_p7 = scmp.lt.s32.totalorder %s1226_s20, 3 }
   0xe   : > { %s1624_s25 = scalar_select %p1304_p4, 1, 0 }
   0xf   : > { %s1625_s26 = scalar_select %p1309_p6, 1, 0 }
  0x10   : > { %p1314_p8 = pnand %p850_p5, %p155_p7  ;;  %s1228_s28 = smov [#allocation5]  }
  0x11   : > { %s167_s29 = sshll.u32 %s1228_s28, 4  ;;  %s33_s5 = sadd.s32 1, %s1222_s19  ;;  %s168_s29 = int_to_ptr.vmem [resolvable:$true] %s167_s29 }
  0x12   : > { %s1626_s27 = scalar_select %p1314_p8, 1, 0 }
  0x13   : > { %p989_p9 = pneg %p1314_p8  ;;  %s1082_s8 = scalar_lea.hbm %s1614_s1, 1024 }
  0x14   : > { %p1083_p12 = scmp.ne.s32.totalorder %s1614_s1, %s1082_s8  ;;  %p1089_p5 = scmp.lt.u32.totalorder %s1082_s8, %s1614_s1 }
  0x15   : > { %p1323_p11 = pnand %p989_p9, %p1294_p1 }
  0x17   : > { %p1084_p13 = pneg %p1323_p11 }
  0x19   : > { %p1085_p0 = pnand %p1084_p13, %p1083_p12 }
  0x1b   : > { %p1086_p3 = pneg %p1085_p0 }
  0x1d   : > { %p1091_p7 = pnand %p1089_p5, %p1086_p3 }
  0x1f   : > { %1094 = shalt.err (!%p1091_p7)
}
  0x20   : > { %s1095_s13 = scalar_lea.vmem %s168_s29, 1024  ;;  %p1103_p1 = scmp.lt.s32.totalorder %s168_s29, %s168_s29 }
  0x21   : > { %p1096_p9 = scmp.ne.s32.totalorder %s168_s29, %s1095_s13  ;;  %p1104_p4 = scmp.lt.s32.totalorder %s1095_s13, %s1095_s13 }
  0x23   : > { %p1098_p10 = pnand %p1096_p9, %p1084_p13  ;;  %p1105_p8 = por %p1104_p4, %p1103_p1 }
  0x25   : > { %p1099_p6 = pneg %p1098_p10 }
  0x27   : > { %p1106_p2 = pnand %p1105_p8, %p1099_p6 }
  0x29   : > { %1109 = shalt.err (!%p1106_p2)
}
  0x2a   : > { %s1229_s14 = smov 64   ;;  %s1230_s21 = smov 4  }
  0x2b   : > { %992 = dma.hbm_to_vmem [thread:$0]  (!%p1323_p11), %s1614_s1, 1024, %s168_s29, [#allocation6], %s1229_s14, %s1229_s14, %s1230_s21  }
  0x2c   : > { %p35_p1 = scmp.ge.s32.totalorder %s33_s5, 2  ;;  %s42_s6 = sadd.s32 1, %s1214_s17 }
  0x2d   : > { %p49_p2 = scmp.ne.s32.totalorder %s1214_s17, %s1210_s16  ;;  %p50_p4 = scmp.eq.s32.totalorder %s1226_s20, 0 }
  0x2e   : > { %s1643_s5 = smov (%p35_p1, %s33_s5), 0  ;;  %p1629_p8 = scmp.ne.s32.totalorder %s1623_s24, 0 }
  0x2f   : > { %p1353_p6 = por %p50_p4, %p49_p2  ;;  %s37_s8 = ssub.s32 %s1222_s19, %s1643_s5 }
  0x30   : > { %p1359_p10 = por %p1629_p8, %p49_p2  ;;  %p1002_p12 = scmp.lt.s32.totalorder %s1226_s20, 2 }
  0x31   : > { %p40_p11 = scmp.eq.s32.totalorder %s37_s8, 0  ;;  %s187_s29 = sand.u32 1, %s1214_s17  }
  0x32   : > { %s853_s9 = sshll.u32 %s187_s29, 7  ;;  %s891_s11 = sshll.u32 %s1222_s19, 11 }
  0x33   : > { %s1368_s10 = scalar_select %p40_p11, %s1214_s17, %s42_s6  }
  0x34   : > { %s1374_s22 = scalar_lea.hbm %s1613_s0, %s891_s11  ;;  %s191_s24 = scalar_lea.vmem [#allocation2], %s853_s9 }
  0x35   : > { %s199_s28 = sshll.u32 %s191_s24, 4  ;;  %p1380_p13 = pnand %p1002_p12, %p1353_p6  ;;  %s1376_s28 = int_to_ptr.vmem [resolvable:$true] %s199_s28 }
  0x36   : > { %s1384_s6 = scalar_lea.sflag [#allocation3], %s187_s29  ;;  %s1110_s12 = scalar_lea.hbm %s1374_s22, 2048 }
  0x37   : > { %p1111_p0 = scmp.ne.s32.totalorder %s1374_s22, %s1110_s12  ;;  %p1112_p3 = pneg %p1380_p13 }
  0x38   : > { %s1115_s7 = scalar_lea.hbm %s1613_s0, 4096  ;;  %p1116_p9 = scmp.lt.u32.totalorder %s1374_s22, %s1613_s0 }
  0x39   : > { %p1113_p5 = pnand %p1112_p3, %p1111_p0  ;;  %p1117_p1 = scmp.lt.u32.totalorder %s1115_s7, %s1110_s12 }
  0x3a   : > { %p1119_p4 = scmp.lt.u32.totalorder %s1110_s12, %s1374_s22 }
  0x3b   : > { %p1114_p7 = pneg %p1113_p5  ;;  %p1118_p2 = por %p1117_p1, %p1116_p9 }
  0x3d   : > { %p1120_p6 = por %p1119_p4, %p1118_p2 }
  0x3f   : > { %p1121_p8 = pnand %p1120_p6, %p1114_p7 }
  0x41   : > { %1124 = shalt.err (!%p1121_p8)
}
  0x42   : > { %s1125_s29 = scalar_lea.vmem %s1376_s28, 2048  ;;  %s1231_s9 = smov [#allocation2]  }
  0x43   : > { %p1126_p12 = scmp.ne.s32.totalorder %s1376_s28, %s1125_s29  ;;  %s1130_s11 = sshll.u32 %s1231_s9, 4  ;;  %s1131_s11 = int_to_ptr.vmem [resolvable:$false] %s1130_s11 }
  0x44   : > { %s1132_s13 = scalar_lea.vmem %s1131_s11, 4096  ;;  %p1133_p5 = scmp.lt.s32.totalorder %s1376_s28, %s1131_s11 }
  0x45   : > { %p1128_p11 = pnand %p1126_p12, %p1112_p3  ;;  %p1134_p9 = scmp.lt.s32.totalorder %s1132_s13, %s1125_s29 }
  0x47   : > { %p1129_p0 = pneg %p1128_p11  ;;  %p1135_p1 = por %p1134_p9, %p1133_p5 }
  0x49   : > { %p1136_p2 = pnand %p1135_p1, %p1129_p0 }
  0x4b   : > { %1139 = shalt.err (!%p1136_p2)
}
  0x4c   : > { %996 = dma.hbm_to_vmem [thread:$0]  (!%p1380_p13), %s1374_s22, 2048, %s1376_s28, %s1384_s6, %s1229_s14, %s1229_s14, %s1230_s21  }
  0x4d   : > { %p1632_p3 = scmp.ne.s32.totalorder %s1626_s27, 0 }
  0x4e   : > { %s1418_s12 = sand.u32 (!%p1632_p3), 1, %s1210_s16   ;;  %p1633_p7 = scmp.ne.s32.totalorder (!%p1632_p3), %s1624_s25, 0 }
  0x4f   : > { %211 = sbr.rel (%p1632_p3) target bundleno = 383 (0x17f), region = 36  ;;  %s857_s7 = sshll.u32 (!%p1632_p3), %s1418_s12, 7 }
  0x50   : > { %s214_s24 = scalar_lea.sflag (!%p1632_p3), [#allocation3], %s1418_s12  ;;  %s1422_s29 = scalar_lea.vmem (!%p1632_p3), [#allocation2], %s857_s7 }
  0x56   : > { %1193 = dma.done.wait (%p1633_p7), %s214_s24, 2048  }
  0x57   : > { %1195 = vsyncadd (%p1633_p7), %s214_s24, 4294965248  ;;  %p1634_p13 = scmp.ne.s32.totalorder %s1622_s23, 0 }
  0x59   : > { %1197 = dma.done.wait (%p1634_p13), [#allocation6], 1024  }
  0x5a   : > { %1199 = vsyncadd (%p1634_p13), [#allocation6], 4294966272  ;;  %v1058_v0 = vld [vmem:[#allocation5] sm:$0xff]   ;;  %v1059_v1 = vld [vmem:[#allocation5 + $0x8] sm:$0xff]   ;;  %s859_s21 = sshll.u32 %s1418_s12, 8  ;;  %s892_s28 = sshll.u32 %s1218_s18, 12 }
  0x5b   : > { %917 = vmatprep.subr.bf16.mxu0 %v1058_v0  ;;  %965 = vmatprep.subr.bf16.mxu1 %v1058_v0  ;;  %v1060_v2 = vld [vmem:[#allocation5 + $0x10] sm:$0xff]   ;;  %v1061_v3 = vld [vmem:[#allocation5 + $0x18] sm:$0xff]   ;;  %v1066_v4 = vld [vmem:[%s1422_s29] sm:$0xff]   ;;  %s1475_s22 = scalar_lea.vmem [#allocation7], %s859_s21  ;;  %s1556_s9 = scalar_lea.hbm %s1617_s4, %s892_s28 }
  0x5c   : > { %918 = vmatpush3.bf16.msra.mxu0 %v1058_v0  ;;  %973 = vmatpush3.bf16.msra.mxu1 %v1058_v0  ;;  %v1067_v5 = vld [vmem:[%s1422_s29 + $0x40] sm:$0xff]   ;;  %v1063_v7 = vld [vmem:[#allocation5 + $0x28] sm:$0xff]   ;;  %v1064_v8 = vld [vmem:[#allocation5 + $0x30] sm:$0xff]   ;;  %s758_s8 = sshll.u32 %s1475_s22, 4  ;;  %s745_s11 = scalar_lea.sflag [#allocation4], %s1418_s12  ;;  %s1558_s8 = int_to_ptr.vmem [resolvable:$true] %s758_s8 }
  0x5d   : > { %919 = vmatprep.subr.bf16.mxu0 %v1059_v1  ;;  %966 = vmatprep.subr.bf16.mxu1 %v1059_v1  ;;  %v1062_v6 = vld [vmem:[#allocation5 + $0x20] sm:$0xff]   ;;  %v1065_v9 = vld [vmem:[#allocation5 + $0x38] sm:$0xff]   ;;  %v1068_v10 = vld [vmem:[%s1422_s29 + $0x8] sm:$0xff]   ;;  %s1140_s13 = scalar_lea.vmem %s1558_s8, 4096  ;;  %s1232_s7 = smov [#allocation7]  }
  0x5e   : > { %933 = vmatprep.mubr.bf16.mxu0 %v1066_v4  ;;  %949 = vmatprep.mubr.bf16.mxu1 %v1067_v5  ;;  %v1069_v11 = vld [vmem:[%s1422_s29 + $0x48] sm:$0xff]   ;;  %v1070_v12 = vld [vmem:[%s1422_s29 + $0x10] sm:$0xff]   ;;  %v1072_v14 = vld [vmem:[%s1422_s29 + $0x18] sm:$0xff]   ;;  %p1141_p4 = scmp.ne.s32.totalorder %s1558_s8, %s1140_s13  ;;  %s1144_s24 = sshll.u32 %s1232_s7, 4  ;;  %s1145_s24 = int_to_ptr.vmem [resolvable:$false] %s1144_s24 }
  0x5f   : > { %v1071_v13 = vld [vmem:[%s1422_s29 + $0x50] sm:$0xff]   ;;  %v1073_v15 = vld [vmem:[%s1422_s29 + $0x58] sm:$0xff]   ;;  %v1074_v16 = vld [vmem:[%s1422_s29 + $0x20] sm:$0xff]   ;;  %p1147_p12 = scmp.lt.s32.totalorder %s1558_s8, %s1145_s24 }
  0x60   : > { %920 = vmatpush3.bf16.msra.mxu0 %v1059_v1  ;;  %974 = vmatpush3.bf16.msra.mxu1 %v1059_v1  ;;  %v1075_v17 = vld [vmem:[%s1422_s29 + $0x60] sm:$0xff]   ;;  %v1076_v18 = vld [vmem:[%s1422_s29 + $0x28] sm:$0xff]   ;;  %v1078_v20 = vld [vmem:[%s1422_s29 + $0x30] sm:$0xff]   ;;  %p1142_p6 = pnand %p1141_p4, %p1359_p10 }
  0x61   : > { %921 = vmatprep.subr.bf16.mxu0 %v1060_v2  ;;  %967 = vmatprep.subr.bf16.mxu1 %v1060_v2  ;;  %v1077_v19 = vld [vmem:[%s1422_s29 + $0x68] sm:$0xff]   ;;  %v1079_v21 = vld [vmem:[%s1422_s29 + $0x70] sm:$0xff]   ;;  %v1080_v22 = vld [vmem:[%s1422_s29 + $0x38] sm:$0xff]  }
  0x62   : > { %v1081_v23 = vld [vmem:[%s1422_s29 + $0x78] sm:$0xff]   ;;  %v1451_v24 = vld [vmem:[%s1615_s2] ss:$0 sm:$0xff]  ;;  %p1143_p8 = pneg %p1142_p6  ;;  %s1146_s29 = scalar_lea.vmem %s1145_s24, 8192 }
  0x63   : > { %v1456_v26 = vld [vmem:[%s1616_s3] ss:$0 sm:$0xff]  ;;  %p1148_p11 = scmp.lt.s32.totalorder %s1146_s29, %s1140_s13 }
  0x64   : > { %922 = vmatpush3.bf16.msra.mxu0 %v1060_v2  ;;  %975 = vmatpush3.bf16.msra.mxu1 %v1060_v2 }
  0x65   : > { %923 = vmatprep.subr.bf16.mxu0 %v1061_v3  ;;  %968 = vmatprep.subr.bf16.mxu1 %v1061_v3  ;;  %p1149_p0 = por %p1148_p11, %p1147_p12 }
  0x67   : > { %p1150_p5 = pnand %p1149_p0, %p1143_p8 }
  0x68   : > { %924 = vmatpush3.bf16.msra.mxu0 %v1061_v3  ;;  %976 = vmatpush3.bf16.msra.mxu1 %v1061_v3 }
  0x69   : > { %925 = vmatprep.subr.bf16.mxu0 %v1062_v6  ;;  %969 = vmatprep.subr.bf16.mxu1 %v1062_v6 }
  0x6c   : > { %926 = vmatpush3.bf16.msra.mxu0 %v1062_v6  ;;  %977 = vmatpush3.bf16.msra.mxu1 %v1062_v6 }
  0x6d   : > { %927 = vmatprep.subr.bf16.mxu0 %v1063_v7  ;;  %970 = vmatprep.subr.bf16.mxu1 %v1063_v7 }
  0x70   : > { %928 = vmatpush3.bf16.msra.mxu0 %v1063_v7  ;;  %978 = vmatpush3.bf16.msra.mxu1 %v1063_v7 }
  0x71   : > { %929 = vmatprep.subr.bf16.mxu0 %v1064_v8  ;;  %971 = vmatprep.subr.bf16.mxu1 %v1064_v8 }
  0x74   : > { %930 = vmatpush3.bf16.msra.mxu0 %v1064_v8  ;;  %979 = vmatpush3.bf16.msra.mxu1 %v1064_v8 }
  0x75   : > { %931 = vmatprep.subr.bf16.mxu0 %v1065_v9  ;;  %972 = vmatprep.subr.bf16.mxu1 %v1065_v9 }
  0x78   : > { %932 = vmatpush3.bf16.msra.mxu0 %v1065_v9  ;;  %980 = vmatpush3.bf16.msra.mxu1 %v1065_v9 }
  0x7b   : > { %934 = vmatmul.mubr.bf16.vlgmr.msra.gmra.mrb[0].mxu0 %v1068_v10  ;;  %950 = vmatmul.mubr.bf16.vlgmr.msra.gmra.mrb[0].mxu1 %v1069_v11 }
  0x7c   : > { %937 = vmatprep.mubr.bf16.mxu0 %v1070_v12  ;;  %953 = vmatprep.mubr.bf16.mxu1 %v1071_v13 }
  0x83   : > { %938 = vmatmul.mubr.bf16.gmra.mrb[4].mxu0 %v1072_v14  ;;  %954 = vmatmul.mubr.bf16.gmra.mrb[4].mxu1 %v1073_v15 }
  0x84   : > { %941 = vmatprep.mubr.bf16.mxu0 %v1074_v16  ;;  %957 = vmatprep.mubr.bf16.mxu1 %v1075_v17 }
  0x8b   : > { %942 = vmatmul.mubr.bf16.gmra.mrb[8].mxu0 %v1076_v18  ;;  %958 = vmatmul.mubr.bf16.gmra.mrb[8].mxu1 %v1077_v19 }
  0x8c   : > { %945 = vmatprep.mubr.bf16.mxu0 %v1078_v20  ;;  %961 = vmatprep.mubr.bf16.mxu1 %v1079_v21 }
  0x93   : > { %946 = vmatmul.mubr.bf16.gmra.mrb[12].mxu0 %v1080_v22  ;;  %962 = vmatmul.mubr.bf16.gmra.mrb[12].mxu1 %v1081_v23 }
 0x14e   : > { %v935_v25 = vpop.f32.mrb[0].mxu0  ;;  %v951_v27 = vpop.f32.mrb[0].mxu1 }
 0x14f   : > { %v611_v28 = vmul.f32 %v935_v25, %v1451_v24  ;;  %v627_v29 = vmul.f32 %v951_v27, %v1451_v24  ;;  %v475_v30 = vpop.f32.mrb[1].mxu0  ;;  %v539_v31 = vpop.f32.mrb[1].mxu1 }
 0x150   : > { %v609_v32 = vmul.f32 %v1451_v24, %v475_v30  ;;  %v625_v33 = vmul.f32 %v1451_v24, %v539_v31  ;;  %v936_v34 = vpop.f32.mrb[2].mxu0  ;;  %v952_v35 = vpop.f32.mrb[2].mxu1 }
 0x151   : > { %v650_v36 = vadd.f32 %v1456_v26, %v611_v28  ;;  %v666_v37 = vadd.f32 %v1456_v26, %v627_v29  ;;  %v612_v38 = vmul.f32 %v936_v34, %v1451_v24  ;;  %v628_v39 = vmul.f32 %v952_v35, %v1451_v24  ;;  %v478_v40 = vpop.f32.mrb[3].mxu0  ;;  %v542_v41 = vpop.f32.mrb[3].mxu1 }
 0x152   : > { %v648_v42 = vadd.f32 %v1456_v26, %v609_v32  ;;  %v664_v43 = vadd.f32 %v1456_v26, %v625_v33  ;;  %v610_v44 = vmul.f32 %v1451_v24, %v478_v40  ;;  %v626_v45 = vmul.f32 %v1451_v24, %v542_v41 }
 0x153   : > { %v682_v46 = vmax.f32 %v650_v36, 0.0  ;;  %v698_v47 = vmax.f32 %v666_v37, 0.0  ;;  %v651_v48 = vadd.f32 %v1456_v26, %v612_v38  ;;  %v667_v49 = vadd.f32 %v1456_v26, %v628_v39 }
 0x154   : > { %v680_v50 = vmax.f32 %v648_v42, 0.0  ;;  %v696_v51 = vmax.f32 %v664_v43, 0.0  ;;  %v649_v52 = vadd.f32 %v1456_v26, %v610_v44  ;;  %v665_v53 = vadd.f32 %v1456_v26, %v626_v45 }
 0x155   : > { %714 = vst [vmem:[%s1475_s22 + $0x10] sm:$0xff] %v682_v46  ;;  %730 = vst [vmem:[%s1475_s22 + $0x90] sm:$0xff] %v698_v47  ;;  %v683_v54 = vmax.f32 %v651_v48, 0.0  ;;  %v699_v55 = vmax.f32 %v667_v49, 0.0 }
 0x156   : > { %712 = vst [vmem:[%s1475_s22] sm:$0xff] %v680_v50  ;;  %728 = vst [vmem:[%s1475_s22 + $0x80] sm:$0xff] %v696_v51  ;;  %v681_v56 = vmax.f32 %v649_v52, 0.0  ;;  %v697_v57 = vmax.f32 %v665_v53, 0.0  ;;  %v939_v58 = vpop.f32.mrb[4].mxu0  ;;  %v955_v59 = vpop.f32.mrb[4].mxu1 }
 0x157   : > { %715 = vst [vmem:[%s1475_s22 + $0x18] sm:$0xff] %v683_v54  ;;  %731 = vst [vmem:[%s1475_s22 + $0x98] sm:$0xff] %v699_v55  ;;  %v615_v60 = vmul.f32 %v939_v58, %v1451_v24  ;;  %v631_v61 = vmul.f32 %v955_v59, %v1451_v24  ;;  %v491_v62 = vpop.f32.mrb[5].mxu0  ;;  %v555_v63 = vpop.f32.mrb[5].mxu1 }
 0x158   : > { %713 = vst [vmem:[%s1475_s22 + $0x8] sm:$0xff] %v681_v56  ;;  %729 = vst [vmem:[%s1475_s22 + $0x88] sm:$0xff] %v697_v57  ;;  %v613_v0 = vmul.f32 %v1451_v24, %v491_v62  ;;  %v629_v1 = vmul.f32 %v1451_v24, %v555_v63  ;;  %v940_v2 = vpop.f32.mrb[6].mxu0  ;;  %v956_v3 = vpop.f32.mrb[6].mxu1 }
 0x159   : > { %v654_v4 = vadd.f32 %v1456_v26, %v615_v60  ;;  %v670_v5 = vadd.f32 %v1456_v26, %v631_v61  ;;  %v616_v6 = vmul.f32 %v940_v2, %v1451_v24  ;;  %v632_v7 = vmul.f32 %v956_v3, %v1451_v24  ;;  %v494_v8 = vpop.f32.mrb[7].mxu0  ;;  %v558_v9 = vpop.f32.mrb[7].mxu1 }
 0x15a   : > { %v652_v10 = vadd.f32 %v1456_v26, %v613_v0  ;;  %v668_v11 = vadd.f32 %v1456_v26, %v629_v1  ;;  %v614_v12 = vmul.f32 %v1451_v24, %v494_v8  ;;  %v630_v13 = vmul.f32 %v1451_v24, %v558_v9 }
 0x15b   : > { %v686_v14 = vmax.f32 %v654_v4, 0.0  ;;  %v702_v15 = vmax.f32 %v670_v5, 0.0  ;;  %v655_v16 = vadd.f32 %v1456_v26, %v616_v6  ;;  %v671_v17 = vadd.f32 %v1456_v26, %v632_v7 }
 0x15c   : > { %v684_v18 = vmax.f32 %v652_v10, 0.0  ;;  %v700_v19 = vmax.f32 %v668_v11, 0.0  ;;  %v653_v20 = vadd.f32 %v1456_v26, %v614_v12  ;;  %v669_v21 = vadd.f32 %v1456_v26, %v630_v13 }
 0x15d   : > { %718 = vst [vmem:[%s1475_s22 + $0x30] sm:$0xff] %v686_v14  ;;  %734 = vst [vmem:[%s1475_s22 + $0xb0] sm:$0xff] %v702_v15  ;;  %v687_v22 = vmax.f32 %v655_v16, 0.0  ;;  %v703_v23 = vmax.f32 %v671_v17, 0.0 }
 0x15e   : > { %716 = vst [vmem:[%s1475_s22 + $0x20] sm:$0xff] %v684_v18  ;;  %732 = vst [vmem:[%s1475_s22 + $0xa0] sm:$0xff] %v700_v19  ;;  %v685_v25 = vmax.f32 %v653_v20, 0.0  ;;  %v701_v27 = vmax.f32 %v669_v21, 0.0  ;;  %v943_v28 = vpop.f32.mrb[8].mxu0  ;;  %v959_v29 = vpop.f32.mrb[8].mxu1 }
 0x15f   : > { %719 = vst [vmem:[%s1475_s22 + $0x38] sm:$0xff] %v687_v22  ;;  %735 = vst [vmem:[%s1475_s22 + $0xb8] sm:$0xff] %v703_v23  ;;  %v619_v30 = vmul.f32 %v943_v28, %v1451_v24  ;;  %v635_v31 = vmul.f32 %v959_v29, %v1451_v24  ;;  %v507_v32 = vpop.f32.mrb[9].mxu0  ;;  %v571_v33 = vpop.f32.mrb[9].mxu1 }
 0x160   : > { %717 = vst [vmem:[%s1475_s22 + $0x28] sm:$0xff] %v685_v25  ;;  %733 = vst [vmem:[%s1475_s22 + $0xa8] sm:$0xff] %v701_v27  ;;  %v617_v34 = vmul.f32 %v1451_v24, %v507_v32  ;;  %v633_v35 = vmul.f32 %v1451_v24, %v571_v33  ;;  %v944_v36 = vpop.f32.mrb[10].mxu0  ;;  %v960_v37 = vpop.f32.mrb[10].mxu1 }
 0x161   : > { %v658_v38 = vadd.f32 %v1456_v26, %v619_v30  ;;  %v674_v39 = vadd.f32 %v1456_v26, %v635_v31  ;;  %v620_v40 = vmul.f32 %v944_v36, %v1451_v24  ;;  %v636_v41 = vmul.f32 %v960_v37, %v1451_v24  ;;  %v510_v42 = vpop.f32.mrb[11].mxu0  ;;  %v574_v43 = vpop.f32.mrb[11].mxu1 }
 0x162   : > { %v656_v44 = vadd.f32 %v1456_v26, %v617_v34  ;;  %v672_v45 = vadd.f32 %v1456_v26, %v633_v35  ;;  %v618_v46 = vmul.f32 %v1451_v24, %v510_v42  ;;  %v634_v47 = vmul.f32 %v1451_v24, %v574_v43 }
 0x163   : > { %v690_v48 = vmax.f32 %v658_v38, 0.0  ;;  %v706_v49 = vmax.f32 %v674_v39, 0.0  ;;  %v659_v50 = vadd.f32 %v1456_v26, %v620_v40  ;;  %v675_v51 = vadd.f32 %v1456_v26, %v636_v41 }
 0x164   : > { %v688_v52 = vmax.f32 %v656_v44, 0.0  ;;  %v704_v53 = vmax.f32 %v672_v45, 0.0  ;;  %v657_v54 = vadd.f32 %v1456_v26, %v618_v46  ;;  %v673_v55 = vadd.f32 %v1456_v26, %v634_v47 }
 0x165   : > { %722 = vst [vmem:[%s1475_s22 + $0x50] sm:$0xff] %v690_v48  ;;  %738 = vst [vmem:[%s1475_s22 + $0xd0] sm:$0xff] %v706_v49  ;;  %v691_v56 = vmax.f32 %v659_v50, 0.0  ;;  %v707_v57 = vmax.f32 %v675_v51, 0.0 }
 0x166   : > { %720 = vst [vmem:[%s1475_s22 + $0x40] sm:$0xff] %v688_v52  ;;  %736 = vst [vmem:[%s1475_s22 + $0xc0] sm:$0xff] %v704_v53  ;;  %v689_v58 = vmax.f32 %v657_v54, 0.0  ;;  %v705_v59 = vmax.f32 %v673_v55, 0.0  ;;  %v947_v60 = vpop.f32.mrb[12].mxu0  ;;  %v963_v61 = vpop.f32.mrb[12].mxu1 }
 0x167   : > { %723 = vst [vmem:[%s1475_s22 + $0x58] sm:$0xff] %v691_v56  ;;  %739 = vst [vmem:[%s1475_s22 + $0xd8] sm:$0xff] %v707_v57  ;;  %v623_v62 = vmul.f32 %v947_v60, %v1451_v24  ;;  %v639_v63 = vmul.f32 %v963_v61, %v1451_v24  ;;  %v523_v0 = vpop.f32.mrb[13].mxu0  ;;  %v587_v1 = vpop.f32.mrb[13].mxu1 }
 0x168   : > { %721 = vst [vmem:[%s1475_s22 + $0x48] sm:$0xff] %v689_v58  ;;  %737 = vst [vmem:[%s1475_s22 + $0xc8] sm:$0xff] %v705_v59  ;;  %v621_v2 = vmul.f32 %v1451_v24, %v523_v0  ;;  %v637_v3 = vmul.f32 %v1451_v24, %v587_v1  ;;  %v948_v4 = vpop.f32.mrb[14].mxu0  ;;  %v964_v5 = vpop.f32.mrb[14].mxu1 }
 0x169   : > { %v662_v6 = vadd.f32 %v1456_v26, %v623_v62  ;;  %v678_v7 = vadd.f32 %v1456_v26, %v639_v63  ;;  %v624_v8 = vmul.f32 %v948_v4, %v1451_v24  ;;  %v640_v9 = vmul.f32 %v964_v5, %v1451_v24  ;;  %v526_v10 = vpop.f32.mrb[15].mxu0  ;;  %v590_v11 = vpop.f32.mrb[15].mxu1 }
 0x16a   : > { %v660_v12 = vadd.f32 %v1456_v26, %v621_v2  ;;  %v676_v13 = vadd.f32 %v1456_v26, %v637_v3  ;;  %v622_v14 = vmul.f32 %v1451_v24, %v526_v10  ;;  %v638_v15 = vmul.f32 %v1451_v24, %v590_v11 }
 0x16b   : > { %v694_v16 = vmax.f32 %v662_v6, 0.0  ;;  %v710_v17 = vmax.f32 %v678_v7, 0.0  ;;  %v663_v18 = vadd.f32 %v1456_v26, %v624_v8  ;;  %v679_v19 = vadd.f32 %v1456_v26, %v640_v9 }
 0x16c   : > { %v692_v20 = vmax.f32 %v660_v12, 0.0  ;;  %v708_v21 = vmax.f32 %v676_v13, 0.0  ;;  %v661_v22 = vadd.f32 %v1456_v26, %v622_v14  ;;  %v677_v24 = vadd.f32 %v1456_v26, %v638_v15 }
 0x16d   : > { %726 = vst [vmem:[%s1475_s22 + $0x70] sm:$0xff] %v694_v16  ;;  %742 = vst [vmem:[%s1475_s22 + $0xf0] sm:$0xff] %v710_v17  ;;  %v695_v23 = vmax.f32 %v663_v18, 0.0  ;;  %v711_v25 = vmax.f32 %v679_v19, 0.0 }
 0x16e   : > { %724 = vst [vmem:[%s1475_s22 + $0x60] sm:$0xff] %v692_v20  ;;  %740 = vst [vmem:[%s1475_s22 + $0xe0] sm:$0xff] %v708_v21  ;;  %v693_v27 = vmax.f32 %v661_v22, 0.0  ;;  %v709_v28 = vmax.f32 %v677_v24, 0.0 }
 0x16f   : > { %727 = vst [vmem:[%s1475_s22 + $0x78] sm:$0xff] %v695_v23  ;;  %743 = vst [vmem:[%s1475_s22 + $0xf8] sm:$0xff] %v711_v25 }
 0x170   : > { %725 = vst [vmem:[%s1475_s22 + $0x68] sm:$0xff] %v693_v27  ;;  %741 = vst [vmem:[%s1475_s22 + $0xe8] sm:$0xff] %v709_v28 }
 0x171   : > { %1153 = shalt.err (!%p1150_p5)
}
 0x172   : > { %s1154_s23 = scalar_lea.hbm %s1556_s9, 4096  ;;  %s1158_s14 = scalar_lea.hbm %s1617_s4, 8192 }
 0x173   : > { %p1155_p9 = scmp.ne.s32.totalorder %s1556_s9, %s1154_s23  ;;  %p1159_p3 = scmp.lt.u32.totalorder %s1556_s9, %s1617_s4 }
 0x174   : > { %p1160_p7 = scmp.lt.u32.totalorder %s1158_s14, %s1154_s23  ;;  %p1162_p4 = scmp.lt.u32.totalorder %s1154_s23, %s1556_s9 }
 0x175   : > { %p1156_p1 = pnand %p1155_p9, %p1359_p10 }
 0x176   : > { %p1161_p13 = por %p1160_p7, %p1159_p3 }
 0x177   : > { %p1157_p2 = pneg %p1156_p1 }
 0x178   : > { %p1163_p6 = por %p1162_p4, %p1161_p13 }
 0x17a   : > { %p1164_p8 = pnand %p1163_p6, %p1157_p2 }
 0x17c   : > { %1167 = shalt.err (!%p1164_p8)
}
 0x17d   : > { %s1233_s28 = smov 128   ;;  %s1234_s18 = smov 8  }
 0x17e   : > { %987 = dma.vmem_to_hbm [thread:$0]  (%p1359_p10), %s1558_s8, 4096, %s1556_s9, %s745_s11, %s1233_s28, %s1233_s28, %s1234_s18  }
 0x17f PF: > { %s773_s6 = sand.u32 1, %s1206_s15   ;;  %p1635_p12 = scmp.ne.s32.totalorder %s1625_s26, 0 }
 0x180   : > { %p1636_p11 = scmp.ge.s32.totalorder %s1226_s20, 2  ;;  %s774_s13 = scalar_lea.sflag [#allocation4], %s773_s6 }
 0x182   : > { %p998_p0 = pnand %p1636_p11, %p1635_p12 }
 0x184   : > { %1201 = dma.done.wait (!%p998_p0), %s774_s13, 4096  }
 0x185   : > { %1203 = vsyncadd (!%p998_p0), %s774_s13, 4294963200  ;;  %s21_s20 = sadd.s32 1, %s1226_s20   ;;  %s1637_s15 = smov %s1210_s16 }
 0x186   : > { %p18_p5 = scmp.ge.s32.totalorder %s21_s20, 4   ;;  %s1638_s16 = smov %s1214_s17 }
 0x187   : > { %s1639_s17 = smov %s1368_s10  ;;  %s1640_s18 = smov %s1222_s19 }
 0x188   : > { %s1641_s19 = smov %s1643_s5  ;;  %20 = sbr.rel (!%p18_p5) target bundleno = 7 (0x7), region = 85 }
 0x18f   :  { %779 = vsyncpa [#allocation3], 1 }
 0x190   :  { %781 = vsyncpa [#allocation3 + $0x1], 1 }
 0x191   :  { %782 = vsyncpa [#allocation6], 1 }
 0x192   :  { %783 = vsyncpa [#allocation4], 1 }
 0x193   :  { %785 = vsyncpa [#allocation4 + $0x1], 1 }

</bundles_post_ra>
